<compile_context>
chip_gen: v5e
topology: v5e:2x2
jax: 0.10.0
libtpu: 0.0.40
codegen_flags: <defaults>
</compile_context>

<pallas_src>
import jax
import jax.numpy as jnp
from jax.experimental import pallas as pl
from jax.experimental.pallas import tpu as pltpu


def _cdiv(a, b):
    return -(-a // b)


def _round_up(n, m):
    return ((n + m - 1) // m) * m


def _choose_batch_tiling(B, batch_tile_max=1024):
    """Adaptive batch tile: few, large grid steps and minimal padding."""
    nsteps = max(_cdiv(B, batch_tile_max), 1)
    # Keep >= 2 steps for moderate/large batches so the "parallel" axis can be
    # sharded across both TensorCores on v7x.
    if B > 256:
        nsteps = max(nsteps, 2)
    tb = _round_up(_cdiv(B, nsteps), 16)
    B_pad = tb * nsteps
    return tb, nsteps, B_pad


def _critic_kernel(xa_ref, w_in_ref, b1_ref, w2h_ref, b2_ref, w3_ref, b3_ref,
                   o_ref):
    dt = w_in_ref.dtype            # compute dtype (bf16)
    h1p = b1_ref.shape[-1]         # 128-lane-aligned split point (static)

    # Fused fc1 + action branch of fc2: one MXU pass, N = H1p + H2p (fills the
    # 256-wide MXU on v6e/v7x).  f32->bf16 cast of the activations happens
    # here instead of as a separate XLA pass in the wrapper.
    t = jnp.dot(xa_ref[...].astype(dt), w_in_ref[...],
                preferred_element_type=jnp.float32)        # (TB, H1p + H2p)

    h1 = jnp.maximum(t[:, :h1p] + b1_ref[...], 0.0)        # fc1 + ReLU
    a_w2a = t[:, h1p:]                                      # a @ W2a^T

    # fc2(concat([h1, a], 1)) + ReLU == h1 @ W2h^T + a @ W2a^T + b2
    h2 = jnp.maximum(
        jnp.dot(h1.astype(dt), w2h_ref[...],
                preferred_element_type=jnp.float32)
        + a_w2a + b2_ref[...],
        0.0)

    # fc3 (N == 1): VPU multiply + XLU cross-lane reduce instead of a
    # degenerate single-column MXU pass.  b3 is a scalar read from SMEM.
    o_ref[...] = (jnp.sum(h2 * w3_ref[...], axis=-1, keepdims=True)
                  + b3_ref[0, 0])
    # TODO(synk): a lane-dense (1, TB) output row would avoid masked vst.msk
    # stores (most relevant on v5e), but needs a sublane->lane relayout of the
    # reduce result; skipped as a compile-risk vs. tiny-benefit tradeoff
    # (total output is only B floats).


def init_critic_params(key, nb_states, nb_actions, hidden1, hidden2):
    """Deterministic synthetic init with PyTorch nn.Linear shapes ([out, in])."""
    ks = jax.random.split(key, 6)

    def unif(k, shape, fan_in):
        bound = 1.0 / jnp.sqrt(fan_in)
        return jax.random.uniform(k, shape, jnp.float32, -bound, bound)

    return {
        "w1": unif(ks[0], (hidden1, nb_states), nb_states),
        "b1": unif(ks[1], (hidden1,), nb_states),
        "w2": unif(ks[2], (hidden2, hidden1 + nb_actions), hidden1 + nb_actions),
        "b2": unif(ks[3], (hidden2,), hidden1 + nb_actions),
        "w3": unif(ks[4], (1, hidden2), hidden2),
        "b3": unif(ks[5], (1,), hidden2),
    }


def prepare_critic_params(raw, compute_dtype=jnp.bfloat16):
    """One-time hoist of transposes / fc2 split / block-diag pack / casts."""
    H1, S = raw["w1"].shape
    H2 = raw["w2"].shape[0]
    A = raw["w2"].shape[1] - H1
    H1p = _round_up(H1, 128)
    H2p = _round_up(H2, 128)

    w1_t = raw["w1"].T                 # [S,  H1]
    w2h_t = raw["w2"][:, :H1].T        # [H1, H2]
    w2a_t = raw["w2"][:, H1:].T        # [A,  H2]

    # Block-diagonal weight for the fused first MXU pass:
    #   [x | a] @ [[W1^T   0   ],   ->  [ x@W1^T | a@W2a^T ]
    #              [ 0    W2a^T]]
    # H1/H2 are padded to 128-lane multiples so the split is tile-aligned;
    # the zero blocks are exact in bf16 and the padded columns stay exactly 0
    # through ReLU / fc2 / fc3 (their downstream weights are also zero).
    w_in = jnp.zeros((S + A, H1p + H2p), jnp.float32)
    w_in = w_in.at[:S, :H1].set(w1_t)
    w_in = w_in.at[S:, H1p:H1p + H2].set(w2a_t)

    w2h = jnp.zeros((H1p, H2p), jnp.float32).at[:H1, :H2].set(w2h_t)
    b1 = jnp.zeros((1, H1p), jnp.float32).at[0, :H1].set(raw["b1"])
    b2 = jnp.zeros((1, H2p), jnp.float32).at[0, :H2].set(raw["b2"])
    w3_row = jnp.zeros((1, H2p), jnp.float32).at[0, :H2].set(
        raw["w3"].reshape(-1))

    return {
        "w_in": w_in.astype(compute_dtype),    # [S+A, H1p+H2p]
        "w2h": w2h.astype(compute_dtype),      # [H1p, H2p]
        "b1": b1,                              # [1,   H1p]  f32
        "b2": b2,                              # [1,   H2p]  f32
        "w3_row": w3_row,                      # [1,   H2p]  f32
        "b3": raw["b3"].reshape(1, 1).astype(jnp.float32),  # [1, 1] (SMEM)
    }


def critic_forward(x, a, p, *, batch_tile_max=1024):
    """x: [B, nb_states], a: [B, nb_actions] -> [B, 1] (f32)."""
    B, S = x.shape
    A = a.shape[1]

    tb, nsteps, B_pad = _choose_batch_tiling(B, batch_tile_max)

    # Single f32 [x | a] activation stream; the bf16 cast happens inside the
    # kernel so no extra cast pass over the activations in HBM.
    xa = jnp.concatenate([x.astype(jnp.float32), a.astype(jnp.float32)],
                         axis=1)
    if B_pad != B:
        # TODO(synk): short-count / mask the last tile instead of a padded
        # copy; with the adaptive tile the pad waste is already < 16 rows/step.
        xa = jnp.pad(xa, ((0, B_pad - B), (0, 0)))

    resident = lambda arr: pl.BlockSpec(arr.shape, lambda i: (0, 0))

    out = pl.pallas_call(
        _critic_kernel,
        out_shape=jax.ShapeDtypeStruct((B_pad, 1), jnp.float32),
        grid=(nsteps,),
        in_specs=[
            pl.BlockSpec((tb, S + A), lambda i: (i, 0)),   # [x|a] tile (f32)
            resident(p["w_in"]),
            resident(p["b1"]),
            resident(p["w2h"]),
            resident(p["b2"]),
            resident(p["w3_row"]),
            pl.BlockSpec(memory_space=pltpu.MemorySpace.SMEM),  # scalar b3
        ],
        out_specs=pl.BlockSpec((tb, 1), lambda i: (i, 0)),
        compiler_params=pltpu.CompilerParams(
            dimension_semantics=("parallel",)),  # megacore on v7x (>=2 steps)
    )(xa, p["w_in"], p["b1"], p["w2h"], p["b2"], p["w3_row"], p["b3"])
    return out[:B]


def critic_reference_f32(x, a, p):
    h1 = jax.nn.relu(x @ p["w1"].T + p["b1"])
    h2 = jax.nn.relu(jnp.concatenate([h1, a], axis=1) @ p["w2"].T + p["b2"])
    return h2 @ p["w3"].T + p["b3"]


def critic_reference_mixed(x, a, raw, compute_dtype=jnp.bfloat16):
    """Same math as the kernel (bf16 operands, f32 accumulation)."""
    H1 = raw["w1"].shape[0]
    w1_t = raw["w1"].T.astype(compute_dtype)
    w2h_t = raw["w2"][:, :H1].T.astype(compute_dtype)
    w2a_t = raw["w2"][:, H1:].T.astype(compute_dtype)
    h1 = jnp.dot(x.astype(compute_dtype), w1_t,
                 preferred_element_type=jnp.float32) + raw["b1"]
    h1 = jax.nn.relu(h1)
    h2 = (jnp.dot(h1.astype(compute_dtype), w2h_t,
                  preferred_element_type=jnp.float32)
          + jnp.dot(a.astype(compute_dtype), w2a_t,
                    preferred_element_type=jnp.float32)
          + raw["b2"])
    h2 = jax.nn.relu(h2)
    return (jnp.sum(h2 * raw["w3"].reshape(1, -1), axis=-1, keepdims=True)
            + raw["b3"])


if __name__ == "__main__":
    B, nb_states, nb_actions = 8, 32, 8
    hidden1, hidden2 = 128, 128

    key = jax.random.PRNGKey(0)
    kx, ka, kp = jax.random.split(key, 3)
    x = jax.random.normal(kx, (B, nb_states), jnp.float32)
    a = jax.random.normal(ka, (B, nb_actions), jnp.float32)
    raw = init_critic_params(kp, nb_states, nb_actions, hidden1, hidden2)
    params = prepare_critic_params(raw)   # hoisted transposes / fusion / casts

    out = jax.block_until_ready(critic_forward(x, a, params))
    assert out.shape == (B, 1)

    ref_mixed = critic_reference_mixed(x, a, raw)
    ref_f32 = critic_reference_f32(x, a, raw)
    assert jnp.allclose(out, ref_mixed, atol=5e-3, rtol=0.0), \
        "mismatch vs mixed-precision (bf16 operand) reference"
    assert jnp.allclose(out, ref_f32, atol=5e-2, rtol=0.0), \
        "mismatch vs f32 reference"

    # Larger, non-multiple batch: adaptive tiling gives 2 grid steps of 160
    # rows (300 -> 320 padded instead of 512), exercising the pipelined grid
    # and the >=2-step megacore path.
    B2 = 300
    kx2, ka2 = jax.random.split(jax.random.PRNGKey(1), 2)
    x2 = jax.random.normal(kx2, (B2, nb_states), jnp.float32)
    a2 = jax.random.normal(ka2, (B2, nb_actions), jnp.float32)
    out2 = jax.block_until_ready(critic_forward(x2, a2, params))
    assert out2.shape == (B2, 1)
    assert jnp.allclose(out2, critic_reference_mixed(x2, a2, raw),
                        atol=5e-3, rtol=0.0)

    print("KERNEL_OK")
</pallas_src>

<mosaic_0001>
module attributes {stable_mosaic.version = 11 : i64} {
  func.func @_critic_kernel(%arg0: i32, %arg1: memref<16x40xf32, #tpu.memory_space<vmem>>, %arg2: memref<40x256xbf16, #tpu.memory_space<vmem>>, %arg3: memref<1x128xf32, #tpu.memory_space<vmem>>, %arg4: memref<128x128xbf16, #tpu.memory_space<vmem>>, %arg5: memref<1x128xf32, #tpu.memory_space<vmem>>, %arg6: memref<1x128xf32, #tpu.memory_space<vmem>>, %arg7: memref<1x1xf32, #tpu.memory_space<smem>>, %arg8: memref<16x1xf32, #tpu.memory_space<vmem>>) attributes {dimension_semantics = [#tpu.dimension_semantics<parallel>], iteration_bounds = array<i64: 1>, scalar_prefetch = 0 : i64, scratch_operands = 0 : i64, tpu.core_type = #tpu.core_type<tc>, window_params = [{transform_indices = @transform_0, window_bounds = array<i64: 16, 40>}, {pipeline_mode = #tpu.pipeline_mode<synchronous>, transform_indices = @transform_1, window_bounds = array<i64: 40, 256>}, {pipeline_mode = #tpu.pipeline_mode<synchronous>, transform_indices = @transform_2, window_bounds = array<i64: 1, 128>}, {pipeline_mode = #tpu.pipeline_mode<synchronous>, transform_indices = @transform_3, window_bounds = array<i64: 128, 128>}, {pipeline_mode = #tpu.pipeline_mode<synchronous>, transform_indices = @transform_4, window_bounds = array<i64: 1, 128>}, {pipeline_mode = #tpu.pipeline_mode<synchronous>, transform_indices = @transform_5, window_bounds = array<i64: 1, 128>}, {transform_indices = @transform_6, window_bounds = array<i64: 1, 1>}, {transform_indices = @transform_7, window_bounds = array<i64: 16, 1>}]} {
    %c0 = arith.constant 0 : index
    %c0_0 = arith.constant 0 : index
    %0 = vector.load %arg1[%c0, %c0_0] : memref<16x40xf32, #tpu.memory_space<vmem>>, vector<16x40xf32>
    %1 = arith.truncf %0 : vector<16x40xf32> to vector<16x40xbf16>
    %c0_1 = arith.constant 0 : index
    %c0_2 = arith.constant 0 : index
    %2 = vector.load %arg2[%c0_1, %c0_2] : memref<40x256xbf16, #tpu.memory_space<vmem>>, vector<40x256xbf16>
    %cst = arith.constant dense<0.000000e+00> : vector<16x256xf32>
    %3 = tpu.matmul %1, %2, %cst {dimension_numbers = #tpu.dot_dimension_numbers<[1], [0], [0], [1], [0, 0, 1, 1], [], []>} : vector<16x40xbf16>, vector<40x256xbf16>, vector<16x256xf32> -> vector<16x256xf32>
    %4 = vector.extract_strided_slice %3 {offsets = [0, 0], sizes = [16, 128], strides = [1, 1]} : vector<16x256xf32> to vector<16x128xf32>
    %c0_3 = arith.constant 0 : index
    %c0_4 = arith.constant 0 : index
    %5 = vector.load %arg3[%c0_3, %c0_4] : memref<1x128xf32, #tpu.memory_space<vmem>>, vector<1x128xf32>
    %6 = vector.broadcast %5 : vector<1x128xf32> to vector<16x128xf32>
    %7 = arith.addf %4, %6 : vector<16x128xf32>
    %cst_5 = arith.constant 0.000000e+00 : f32
    %8 = vector.broadcast %cst_5 : f32 to vector<16x128xf32>
    %9 = arith.maximumf %7, %8 : vector<16x128xf32>
    %10 = vector.extract_strided_slice %3 {offsets = [0, 128], sizes = [16, 128], strides = [1, 1]} : vector<16x256xf32> to vector<16x128xf32>
    %11 = arith.truncf %9 : vector<16x128xf32> to vector<16x128xbf16>
    %c0_6 = arith.constant 0 : index
    %c0_7 = arith.constant 0 : index
    %12 = vector.load %arg4[%c0_6, %c0_7] : memref<128x128xbf16, #tpu.memory_space<vmem>>, vector<128x128xbf16>
    %cst_8 = arith.constant dense<0.000000e+00> : vector<16x128xf32>
    %13 = tpu.matmul %11, %12, %cst_8 {dimension_numbers = #tpu.dot_dimension_numbers<[1], [0], [0], [1], [0, 0, 1, 1], [], []>} : vector<16x128xbf16>, vector<128x128xbf16>, vector<16x128xf32> -> vector<16x128xf32>
    %14 = arith.addf %13, %10 : vector<16x128xf32>
    %c0_9 = arith.constant 0 : index
    %c0_10 = arith.constant 0 : index
    %15 = vector.load %arg5[%c0_9, %c0_10] : memref<1x128xf32, #tpu.memory_space<vmem>>, vector<1x128xf32>
    %16 = vector.broadcast %15 : vector<1x128xf32> to vector<16x128xf32>
    %17 = arith.addf %14, %16 : vector<16x128xf32>
    %cst_11 = arith.constant 0.000000e+00 : f32
    %18 = vector.broadcast %cst_11 : f32 to vector<16x128xf32>
    %19 = arith.maximumf %17, %18 : vector<16x128xf32>
    %c0_12 = arith.constant 0 : index
    %c0_13 = arith.constant 0 : index
    %20 = vector.load %arg6[%c0_12, %c0_13] : memref<1x128xf32, #tpu.memory_space<vmem>>, vector<1x128xf32>
    %21 = vector.broadcast %20 : vector<1x128xf32> to vector<16x128xf32>
    %22 = arith.mulf %19, %21 : vector<16x128xf32>
    %cst_14 = arith.constant dense<0.000000e+00> : vector<16xf32>
    %23 = vector.multi_reduction <add>, %22, %cst_14 [1] : vector<16x128xf32> to vector<16xf32>
    %24 = vector.shape_cast %23 : vector<16xf32> to vector<16x1xf32>
    %c0_15 = arith.constant 0 : index
    %c0_16 = arith.constant 0 : index
    %25 = memref.load %arg7[%c0_15, %c0_16] : memref<1x1xf32, #tpu.memory_space<smem>>
    %26 = vector.broadcast %25 : f32 to vector<16x1xf32>
    %27 = arith.addf %24, %26 : vector<16x1xf32>
    %c0_17 = arith.constant 0 : index
    %c0_18 = arith.constant 0 : index
    %28 = vector.load %arg8[%c0_17, %c0_18] : memref<16x1xf32, #tpu.memory_space<vmem>>, vector<16x1xf32>
    tpu.vector_store %arg8[%c0_17, %c0_18], %27 {strides = array<i32>} : memref<16x1xf32, #tpu.memory_space<vmem>>, vector<16x1xf32>,
    return
  }
  func.func @transform_0(%arg0: i32) -> (i32, i32) {
    %c0_i32 = arith.constant 0 : i32
    %c0_i32_0 = arith.constant 0 : i32
    return %arg0, %c0_i32 : i32, i32
  }
  func.func @transform_1(%arg0: i32) -> (i32, i32) {
    %c0_i32 = arith.constant 0 : i32
    %c0_i32_0 = arith.constant 0 : i32
    %c0_i32_1 = arith.constant 0 : i32
    return %c0_i32, %c0_i32_0 : i32, i32
  }
  func.func @transform_2(%arg0: i32) -> (i32, i32) {
    %c0_i32 = arith.constant 0 : i32
    %c0_i32_0 = arith.constant 0 : i32
    %c0_i32_1 = arith.constant 0 : i32
    return %c0_i32, %c0_i32_0 : i32, i32
  }
  func.func @transform_3(%arg0: i32) -> (i32, i32) {
    %c0_i32 = arith.constant 0 : i32
    %c0_i32_0 = arith.constant 0 : i32
    %c0_i32_1 = arith.constant 0 : i32
    return %c0_i32, %c0_i32_0 : i32, i32
  }
  func.func @transform_4(%arg0: i32) -> (i32, i32) {
    %c0_i32 = arith.constant 0 : i32
    %c0_i32_0 = arith.constant 0 : i32
    %c0_i32_1 = arith.constant 0 : i32
    return %c0_i32, %c0_i32_0 : i32, i32
  }
  func.func @transform_5(%arg0: i32) -> (i32, i32) {
    %c0_i32 = arith.constant 0 : i32
    %c0_i32_0 = arith.constant 0 : i32
    %c0_i32_1 = arith.constant 0 : i32
    return %c0_i32, %c0_i32_0 : i32, i32
  }
  func.func @transform_6(%arg0: i32) -> (i32, i32) {
    %c0_i32 = arith.constant 0 : i32
    %c0_i32_0 = arith.constant 0 : i32
    %c0_i32_1 = arith.constant 0 : i32
    return %c0_i32, %c0_i32_0 : i32, i32
  }
  func.func @transform_7(%arg0: i32) -> (i32, i32) {
    %c0_i32 = arith.constant 0 : i32
    %c0_i32_0 = arith.constant 0 : i32
    return %arg0, %c0_i32 : i32, i32
  }
}

</mosaic_0001>

<bundles_post_ra>
// kernel: tpu_custom_call.1
= control target key start
LH: loop header
LB: loop body
LE: loop exit
PB: predicated region body
PF: predicated region fallthrough
CT: control target
= control target key end

     0   :  { %13 = vsyncpa [#allocation4], 0  ;;  %s491_s0 = inlined_call_operand.hbm [shape: f32[16,40], index: 0, kind: input, shape index: {}]   ;;  %s492_s1 = inlined_call_operand.hbm [shape: bf16[40,256], index: 1, kind: input, shape index: {}]   ;;  %s493_s2 = inlined_call_operand.vmem [shape: f32[1,128], index: 2, kind: input, shape index: {}]   ;;  %s494_s3 = inlined_call_operand.hbm [shape: bf16[128,128], index: 3, kind: input, shape index: {}]   ;;  %s495_s4 = inlined_call_operand.vmem [shape: f32[1,128], index: 4, kind: input, shape index: {}]   ;;  %s496_s5 = inlined_call_operand.vmem [shape: f32[1,128], index: 5, kind: input, shape index: {}]   ;;  %s497_s6 = inlined_call_operand.<no memory space> [shape: f32[1,1], index: 6, kind: input, shape index: {}]   ;;  %s498_s7 = inlined_call_operand.vmem [shape: f32[16,1], index: 7, kind: output, shape index: {}]  }
   0x1   :  { %14 = vsyncpa [#allocation6], 0  ;;  %s32_s26 = sshll.u32 %s492_s1, 4  ;;  %s413_s27 = smov [#allocation5]   ;;  %s33_s26 = int_to_ptr.hbm [resolvable:$true] %s32_s26 }
   0x2   :  { %s34_s28 = sshll.u32 %s413_s27, 4  ;;  %s19_s8 = sshll.u32 %s491_s0, 4  ;;  %s35_s28 = int_to_ptr.vmem [resolvable:$true] %s34_s28  ;;  %s20_s8 = int_to_ptr.hbm [resolvable:$true] %s19_s8 }
   0x3   :  { %s414_s9 = smov 128   ;;  %s415_s10 = smov 8  }
   0x4   :  { %40 = dma.hbm_to_vmem [thread:$0]  %s33_s26, 640, %s35_s28, [#allocation6], %s414_s9, %s414_s9, %s415_s10  }
   0x5   :  { %s416_s11 = smov [#allocation3]   ;;  %s47_s15 = sshll.u32 %s494_s3, 4  ;;  %s48_s15 = int_to_ptr.hbm [resolvable:$true] %s47_s15 }
   0x6   :  { %s21_s12 = sshll.u32 %s416_s11, 4  ;;  %s417_s1 = smov [#allocation7]   ;;  %s22_s12 = int_to_ptr.vmem [resolvable:$true] %s21_s12 }
   0x7   :  { %27 = dma.hbm_to_vmem [thread:$0]  %s20_s8, 256, %s22_s12, [#allocation4], %s414_s9, %s414_s9, %s415_s10  }
   0x8   :  { %s49_s16 = sshll.u32 %s417_s1, 4  ;;  %s418_s17 = smov 64   ;;  %s50_s16 = int_to_ptr.vmem [resolvable:$true] %s49_s16 }
   0x9   :  { %s419_s18 = smov 4  }
   0xa   :  { %55 = dma.hbm_to_vmem [thread:$0]  %s48_s15, 1024, %s50_s16, [#allocation6], %s418_s17, %s418_s17, %s419_s18  }
   0xb   :  { %409 = dma.done.wait [#allocation4], 256  }
   0xc   :  { %410 = vsyncadd [#allocation4], 4294967040 }
   0xd   :  { %411 = dma.done.wait [#allocation6], 1664  }
   0xe   :  { %412 = vsyncadd [#allocation6], 4294965632  ;;  %v82_v0 = vld [vmem:[#allocation5 + $0x20] sm:$0xff]  ;;  %vm112_vm0 = vcmask 1043456   ;;  %v275_v4 = vld [vmem:[#allocation5 + $0x10] sm:$0xf]  ;;  %v253_v52 = vstv %s497_s6 }
   0xf   :  { %v96_v1 = vunpack.c.l.b16 %v82_v0  ;;  %v326_v2 = vld [vmem:[#allocation7 + $0x38] sm:$0xff]  ;;  %v318_v5 = vld [vmem:[#allocation5 + $0x14] sm:$0xf0]  ;;  %v316_v10 = vld [vmem:[#allocation5 + $0x4] sm:$0xf0]  ;;  %vm108_vm1 = vcmask 326656   ;;  %v97_v17 = vunpack.c.h.b16 %v82_v0 }
  0x10   :  { %220 = vmatpush.bf16.msra.mxu2 %v326_v2  ;;  %v325_v6 = vld [vmem:[#allocation7 + $0x30] sm:$0xff]  ;;  %v276_v8 = vor.u32 %v318_v5, %v275_v4  ;;  %v267_v9 = vld [vmem:[#allocation5] sm:$0xf]  ;;  %v324_v11 = vld [vmem:[#allocation7 + $0x28] sm:$0xff]  ;;  %vm256_vm2 = vcmask 7168  }
  0x11   :  { %v102_v3 = vpack.c.b16 %v96_v1, %v96_v1  ;;  %v268_v12 = vor.u32 %v316_v10, %v267_v9  ;;  %v75_v13 = vld [vmem:[#allocation3] sm:$0xff]  ;;  %v76_v14 = vld [vmem:[#allocation3 + $0x8] sm:$0xff]  ;;  %v323_v15 = vld [vmem:[#allocation7 + $0x20] sm:$0xff]  ;;  %v103_v19 = vpack.c.b16 %v97_v17, %v97_v17 }
  0x12   :  { %v77_v16 = vpack.c.bf16 %v76_v14, %v75_v13  ;;  %v322_v18 = vld [vmem:[#allocation7 + $0x18] sm:$0xff]  ;;  %v321_v21 = vld [vmem:[#allocation7 + $0x10] sm:$0xff]  ;;  %v317_v22 = vld [vmem:[#allocation5 + $0x14] sm:$0xf] }
  0x13   :  { %v114_v7 = vsel %vm112_vm0, %v102_v3, 0  ;;  %v117_v20 = vsel %vm112_vm0, %v103_v19, 0  ;;  %v277_v23 = vld [vmem:[#allocation5 + $0x18] sm:$0xf0]  ;;  %v320_v25 = vld [vmem:[#allocation7 + $0x8] sm:$0xff]  ;;  %v319_v29 = vld [vmem:[#allocation7] sm:$0xff] }
  0x14   :  { %124 = vmatpush.bf16.msra.mxu0 %v114_v7  ;;  %221 = vmatpush.bf16.msra.mxu2 %v325_v6  ;;  %v280_v24 = vor.u32 %v317_v22, %v277_v23  ;;  %v315_v26 = vld [vmem:[#allocation5 + $0x4] sm:$0xf]  ;;  %v269_v27 = vld [vmem:[#allocation5 + $0x8] sm:$0xf0]  ;;  %v334_v31 = vld [vmem:[%s493_s2] ss:$0 sm:$0xff] }
  0x15   :  { %138 = vmatpush.bf16.msra.mxu1 %v117_v20  ;;  %v272_v28 = vor.u32 %v315_v26, %v269_v27  ;;  %v335_v39 = vld [vmem:[%s495_s4] ss:$0 sm:$0xff] }
  0x16   :  { %v336_v43 = vld [vmem:[%s496_s5] ss:$0 sm:$0xff] }
  0x18   :  { %125 = vmatpush.bf16.msra.mxu0 %v276_v8  ;;  %222 = vmatpush.bf16.msra.mxu2 %v324_v11 }
  0x19   :  { %139 = vmatpush.bf16.msra.mxu1 %v280_v24 }
  0x1c   :  { %126 = vmatpush.bf16.msra.mxu0 %v268_v12  ;;  %223 = vmatpush.bf16.msra.mxu2 %v323_v15 }
  0x1d   :  { %140 = vmatpush.bf16.msra.mxu1 %v272_v28 }
  0x1f   :  { %281 = vmatmul.msk.bf16.vlgmr.msra.gmra.mxu0 %vm108_vm1, %v77_v16 }
  0x20   :  { %224 = vmatpush.bf16.msra.mxu2 %v322_v18  ;;  %282 = vmatmul.msk.bf16.vlgmr.msra.gmra.mxu1 %vm108_vm1, %v77_v16 }
  0x24   :  { %225 = vmatpush.bf16.msra.mxu2 %v321_v21 }
  0x28   :  { %226 = vmatpush.bf16.msra.mxu2 %v320_v25 }
  0x2c   :  { %227 = vmatpush.bf16.msra.mxu2 %v319_v29 }
  0x9c   :  { %v128_v30 = vpop.f32.mrf.mxu0 }
  0x9d   :  { %v151_v32 = vadd.f32 %v334_v31, %v128_v30  ;;  %v142_v38 = vpop.f32.mrf.mxu1 }
  0x9f   :  { %v153_v35 = vmax.f32 %v151_v32, 0.0 }
  0xa4   :  { %v130_v33 = vpop.f32.mrf.mxu0 }
  0xa5   :  { %v152_v34 = vadd.f32 %v334_v31, %v130_v33  ;;  %v144_v46 = vpop.f32.mrf.mxu1 }
  0xa7   :  { %v154_v36 = vmax.f32 %v152_v34, 0.0 }
  0xa9   :  { %v155_v37 = vpack.c.bf16 %v154_v36, %v153_v35 }
  0xab   :  { %228 = vmatmul.bf16.vlgmr.msra.gmra.mxu2 %v155_v37 }
 0x12e   :  { %v229_v40 = vpop.f32.mrf.mxu2 }
 0x12f   :  { %v230_v41 = vadd.f32 %v229_v40, %v142_v38 }
 0x131   :  { %v238_v42 = vadd.f32 %v335_v39, %v230_v41 }
 0x133   :  { %v240_v44 = vmax.f32 %v238_v42, 0.0 }
 0x135   :  { %v246_v45 = vmul.f32 %v336_v43, %v240_v44 }
 0x136   :  { %v231_v47 = vpop.f32.mrf.mxu2 }
 0x137   :  { %v232_v48 = vadd.f32 %v231_v47, %v144_v46  ;;  %248 = vadd.xlane.f32.xlu0 %v246_v45 }
 0x139   :  { %v239_v49 = vadd.f32 %v335_v39, %v232_v48 }
 0x13b   :  { %v241_v50 = vmax.f32 %v239_v49, 0.0 }
 0x13d   :  { %v247_v51 = vmul.f32 %v336_v43, %v241_v50 }
 0x13f   :  { %250 = vadd.xlane.f32.xlu0 %v247_v51 }
 0x1aa   :  { %v249_v53 = vpop.xlane.xlu0 %248 }
 0x1ab   :  { %v254_v54 = vadd.f32 %v253_v52, %v249_v53 }
 0x1ad   :  { %257 = vst.msk [vmem:[%s498_s7] sm:$0xff] %vm256_vm2, %v254_v54 }
 0x1b2   :  { %v251_v55 = vpop.xlane.xlu0 %250 }
 0x1b3   :  { %v255_v56 = vadd.f32 %v253_v52, %v251_v55 }
 0x1b5   :  { %258 = vst.msk [vmem:[%s498_s7 + $0x8] sm:$0xff] %vm256_vm2, %v255_v56 }
 0x1b6   :  { %263 = vsyncpa [#allocation4], 1 }
 0x1b7   :  { %264 = vsyncpa [#allocation6], 1 }

</bundles_post_ra>
